<compile_context>
chip_gen: v7x
topology: tpu7x:2x2x1
jax: 0.10.0
libtpu: 0.0.40
codegen_flags: <defaults>
</compile_context>

<pallas_src>
import functools

import jax
import jax.numpy as jnp
from jax.experimental import pallas as pl
from jax.experimental.pallas import tpu as pltpu


def _round_up(x, m):
    return ((x + m - 1) // m) * m


def _fused_kernel(x_ref, w_ref, b_ref, o_ref):
    # x_ref: (TB, CF)  compute dtype  -- batch tile, flattened channel*filter features
    # w_ref: (CF, CF)  compute dtype  -- kron(Wc, Wf)^T, resident (constant index map)
    # b_ref: (1, CF)   float32        -- fused bias row
    # o_ref: (TB, CF)  float32        -- lane-dense output (CF is a multiple of 128)
    y = jnp.dot(x_ref[...], w_ref[...], preferred_element_type=jnp.float32)
    o_ref[...] = (y + b_ref[...]).astype(o_ref.dtype)


@functools.partial(jax.jit, static_argnames=("block_b", "compute_dtype"))
def seperate_fc_interaction(x, wc, bc, wf, bf, *, block_b=256,
                            compute_dtype=jnp.bfloat16):
    """x: (B, C, F); wc: (C, C); bc: (C,); wf: (F, F); bf: (F,)."""
    B, C, F = x.shape
    CF = C * F

    # ---- fuse the two linears (tiny one-time wrapper cost) ----
    # W_fused[c*F+g, c'*F+f] = Wc[c,c'] * Wf[g,f]
    w_fused_t = jnp.kron(wc, wf).T.astype(compute_dtype)          # (CF, CF) = (K, N)
    b_fused = (bc[:, None] * jnp.sum(wf, axis=1)[None, :]
               + bf[None, :]).reshape(1, CF).astype(jnp.float32)  # (1, CF)

    x2d = x.reshape(B, CF).astype(compute_dtype)

    # ---- batch tiling: TB rows per grid step, pad so blocks divide exactly ----
    tb = _round_up(min(block_b, _round_up(B, 8)), 8)
    b_pad = _round_up(B, tb)
    if b_pad != B:
        x2d = jnp.pad(x2d, ((0, b_pad - B), (0, 0)))

    out2d = pl.pallas_call(
        _fused_kernel,
        out_shape=jax.ShapeDtypeStruct((b_pad, CF), x.dtype),
        grid_spec=pltpu.PrefetchScalarGridSpec(
            num_scalar_prefetch=0,
            grid=(b_pad // tb,),
            in_specs=[
                pl.BlockSpec((tb, CF), lambda i: (i, 0)),   # x batch tile
                pl.BlockSpec((CF, CF), lambda i: (0, 0)),   # fused weight (resident)
                pl.BlockSpec((1, CF), lambda i: (0, 0)),    # fused bias (resident)
            ],
            out_specs=pl.BlockSpec((tb, CF), lambda i: (i, 0)),
        ),
        compiler_params=pltpu.CompilerParams(
            dimension_semantics=("parallel",)),  # shard batch tiles across TCs (v7x)
    )(x2d, w_fused_t, b_fused)

    return out2d[:B].reshape(B, C, F)


def _reference(x, wc, bc, wf, bf):
    # Pure-JAX mirror of the PyTorch forward for validation.
    x1 = jnp.einsum("cd,bdf->bcf", wc, x) + bc[None, :, None]
    return jnp.einsum("gf,bcf->bcg", wf, x1) + bf[None, None, :]


if __name__ == "__main__":
    C, F = 8, 32   # sensor_channel, filter_num

    key = jax.random.PRNGKey(0)
    k_x, k_wc, k_bc, k_wf, k_bf, k_x2 = jax.random.split(key, 6)

    wc = jax.random.uniform(k_wc, (C, C), minval=-0.3, maxval=0.3, dtype=jnp.float32)
    bc = jax.random.uniform(k_bc, (C,),   minval=-0.3, maxval=0.3, dtype=jnp.float32)
    wf = jax.random.uniform(k_wf, (F, F), minval=-0.2, maxval=0.2, dtype=jnp.float32)
    bf = jax.random.uniform(k_bf, (F,),   minval=-0.2, maxval=0.2, dtype=jnp.float32)

    # Test 1: small batch, default bf16 compute (MXU-native on v6e/v7x).
    B = 2
    x = jax.random.normal(k_x, (B, C, F), dtype=jnp.float32)
    out = jax.block_until_ready(seperate_fc_interaction(x, wc, bc, wf, bf))
    ref = _reference(x, wc, bc, wf, bf)
    assert out.shape == (B, C, F)
    assert jnp.allclose(out, ref, atol=5e-2, rtol=5e-2), "bf16 Pallas kernel mismatch"

    # Test 2: same inputs, full f32 compute path (tight tolerance).
    out32 = jax.block_until_ready(
        seperate_fc_interaction(x, wc, bc, wf, bf, compute_dtype=jnp.float32))
    assert jnp.allclose(out32, ref, atol=1e-4, rtol=1e-4), "f32 Pallas kernel mismatch"

    # Test 3: non-divisible batch with multiple grid steps (padding + parallel grid).
    B2 = 20
    x2 = jax.random.normal(k_x2, (B2, C, F), dtype=jnp.float32)
    out2 = jax.block_until_ready(
        seperate_fc_interaction(x2, wc, bc, wf, bf, block_b=8,
                                compute_dtype=jnp.float32))
    ref2 = _reference(x2, wc, bc, wf, bf)
    assert jnp.allclose(out2, ref2, atol=1e-4, rtol=1e-4), "multi-tile kernel mismatch"

    print("KERNEL_OK")
</pallas_src>

<mosaic_0001>
module attributes {stable_mosaic.version = 11 : i64} {
  func.func @_fused_kernel(%arg0: i32, %arg1: memref<8x256xbf16, #tpu.memory_space<vmem>>, %arg2: memref<256x256xbf16, #tpu.memory_space<vmem>>, %arg3: memref<1x256xf32, #tpu.memory_space<vmem>>, %arg4: memref<8x256xf32, #tpu.memory_space<vmem>>) attributes {dimension_semantics = [#tpu.dimension_semantics<parallel>], iteration_bounds = array<i64: 1>, scalar_prefetch = 0 : i64, scratch_operands = 0 : i64, tpu.core_type = #tpu.core_type<tc>, window_params = [{transform_indices = @transform_0, window_bounds = array<i64: 8, 256>}, {pipeline_mode = #tpu.pipeline_mode<synchronous>, transform_indices = @transform_1, window_bounds = array<i64: 256, 256>}, {pipeline_mode = #tpu.pipeline_mode<synchronous>, transform_indices = @transform_2, window_bounds = array<i64: 1, 256>}, {transform_indices = @transform_3, window_bounds = array<i64: 8, 256>}]} {
    %c0 = arith.constant 0 : index
    %c0_0 = arith.constant 0 : index
    %0 = vector.load %arg1[%c0, %c0_0] : memref<8x256xbf16, #tpu.memory_space<vmem>>, vector<8x256xbf16>
    %c0_1 = arith.constant 0 : index
    %c0_2 = arith.constant 0 : index
    %1 = vector.load %arg2[%c0_1, %c0_2] : memref<256x256xbf16, #tpu.memory_space<vmem>>, vector<256x256xbf16>
    %cst = arith.constant dense<0.000000e+00> : vector<8x256xf32>
    %2 = tpu.matmul %0, %1, %cst {dimension_numbers = #tpu.dot_dimension_numbers<[1], [0], [0], [1], [0, 0, 1, 1], [], []>} : vector<8x256xbf16>, vector<256x256xbf16>, vector<8x256xf32> -> vector<8x256xf32>
    %c0_3 = arith.constant 0 : index
    %c0_4 = arith.constant 0 : index
    %3 = vector.load %arg3[%c0_3, %c0_4] : memref<1x256xf32, #tpu.memory_space<vmem>>, vector<1x256xf32>
    %4 = vector.broadcast %3 : vector<1x256xf32> to vector<8x256xf32>
    %5 = arith.addf %2, %4 : vector<8x256xf32>
    %c0_5 = arith.constant 0 : index
    %c0_6 = arith.constant 0 : index
    %6 = vector.load %arg4[%c0_5, %c0_6] : memref<8x256xf32, #tpu.memory_space<vmem>>, vector<8x256xf32>
    tpu.vector_store %arg4[%c0_5, %c0_6], %5 {strides = array<i32>} : memref<8x256xf32, #tpu.memory_space<vmem>>, vector<8x256xf32>,
    return
  }
  func.func @transform_0(%arg0: i32) -> (i32, i32) {
    %c0_i32 = arith.constant 0 : i32
    %c0_i32_0 = arith.constant 0 : i32
    return %arg0, %c0_i32 : i32, i32
  }
  func.func @transform_1(%arg0: i32) -> (i32, i32) {
    %c0_i32 = arith.constant 0 : i32
    %c0_i32_0 = arith.constant 0 : i32
    %c0_i32_1 = arith.constant 0 : i32
    return %c0_i32, %c0_i32_0 : i32, i32
  }
  func.func @transform_2(%arg0: i32) -> (i32, i32) {
    %c0_i32 = arith.constant 0 : i32
    %c0_i32_0 = arith.constant 0 : i32
    %c0_i32_1 = arith.constant 0 : i32
    return %c0_i32, %c0_i32_0 : i32, i32
  }
  func.func @transform_3(%arg0: i32) -> (i32, i32) {
    %c0_i32 = arith.constant 0 : i32
    %c0_i32_0 = arith.constant 0 : i32
    return %arg0, %c0_i32 : i32, i32
  }
}

</mosaic_0001>

<bundles_post_ra>
// kernel: seperate_fc_interaction.1
= control target key start
LH: loop header
LB: loop body
LE: loop exit
PB: predicated region body
PF: predicated region fallthrough
CT: control target
= control target key end

     0   :  { %v49_v35 = vlaneseq  ;;  %s485_s1 = inlined_call_operand.vmem [shape: bf16[256,256], index: 1, kind: input, shape index: {}]   ;;  %s486_s0 = inlined_call_operand.vmem [shape: bf16[8,256], index: 0, kind: input, shape index: {}]   ;;  %s487_s2 = inlined_call_operand.vmem [shape: f32[1,256], index: 2, kind: input, shape index: {}]   ;;  %s488_s3 = inlined_call_operand.vmem [shape: f32[8,256], index: 3, kind: output, shape index: {}]  }
   0x1   :  { %v307_v0 = vld [vmem:[%s485_s1 + $0x4] ss:$8 sps:$4 sm:$0xff]   ;;  %v309_v1 = vld [vmem:[%s485_s1] ss:$8 sps:$4 sm:$0xff]   ;;  %v310_v2 = vld [vmem:[%s485_s1 + $0x14] ss:$8 sps:$4 sm:$0xff]  }
   0x2   :  { %226 = vmatprep.subr.bf16.mxu0 %v307_v0  ;;  %v312_v3 = vld [vmem:[%s485_s1 + $0x10] ss:$8 sps:$4 sm:$0xff]   ;;  %v313_v4 = vld [vmem:[%s485_s1 + $0x24] ss:$8 sps:$4 sm:$0xff]   ;;  %v315_v5 = vld [vmem:[%s485_s1 + $0x20] ss:$8 sps:$4 sm:$0xff]  }
   0x3   :  { %227 = vmatpush1.bf16.msra.mxu0 %v309_v1  ;;  %v316_v6 = vld [vmem:[%s485_s1 + $0x34] ss:$8 sps:$4 sm:$0xff]   ;;  %v318_v7 = vld [vmem:[%s485_s1 + $0x30] ss:$8 sps:$4 sm:$0xff]   ;;  %v319_v8 = vld [vmem:[%s485_s1 + $0x44] ss:$8 sps:$4 sm:$0xff]  }
   0x4   :  { %228 = vmatprep.subr.bf16.mxu0 %v310_v2  ;;  %v321_v9 = vld [vmem:[%s485_s1 + $0x40] ss:$8 sps:$4 sm:$0xff]   ;;  %v322_v10 = vld [vmem:[%s485_s1 + $0x54] ss:$8 sps:$4 sm:$0xff]   ;;  %v324_v11 = vld [vmem:[%s485_s1 + $0x50] ss:$8 sps:$4 sm:$0xff]  }
   0x5   :  { %v325_v12 = vld [vmem:[%s485_s1 + $0x64] ss:$8 sps:$4 sm:$0xff]   ;;  %v327_v15 = vld [vmem:[%s485_s1 + $0x60] ss:$8 sps:$4 sm:$0xff]   ;;  %v328_v16 = vld [vmem:[%s485_s1 + $0x74] ss:$8 sps:$4 sm:$0xff]  }
   0x6   :  { %v14_v13 = vld [vmem:[%s486_s0] sm:$0xff]  ;;  %v330_v17 = vld [vmem:[%s485_s1 + $0x70] ss:$8 sps:$4 sm:$0xff]   ;;  %v334_v20 = vld [vmem:[%s485_s1 + $0x94] ss:$8 sps:$4 sm:$0xff]   ;;  %v50_v36 = vshrl.u32 %v49_v35, 7 }
   0x7   :  { %229 = vmatpush1.bf16.msra.mxu0 %v312_v3  ;;  %v274_v14 = vcombine.high %v14_v13, %v14_v13  ;;  %v331_v18 = vld [vmem:[%s485_s1 + $0x84] ss:$8 sps:$4 sm:$0xff]   ;;  %v333_v19 = vld [vmem:[%s485_s1 + $0x80] ss:$8 sps:$4 sm:$0xff]   ;;  %v336_v21 = vld [vmem:[%s485_s1 + $0x90] ss:$8 sps:$4 sm:$0xff]   ;;  %v273_v34 = vcombine.low %v14_v13, %v14_v13 }
   0x8   :  { %230 = vmatprep.subr.bf16.mxu0 %v313_v4  ;;  %v337_v22 = vld [vmem:[%s485_s1 + $0xa4] ss:$8 sps:$4 sm:$0xff]   ;;  %v339_v23 = vld [vmem:[%s485_s1 + $0xa0] ss:$8 sps:$4 sm:$0xff]   ;;  %v340_v24 = vld [vmem:[%s485_s1 + $0xb4] ss:$8 sps:$4 sm:$0xff]  }
   0x9   :  { %258 = vmatprep.mubr.bf16.mxu0 %v274_v14  ;;  %v342_v25 = vld [vmem:[%s485_s1 + $0xb0] ss:$8 sps:$4 sm:$0xff]   ;;  %v343_v26 = vld [vmem:[%s485_s1 + $0xc4] ss:$8 sps:$4 sm:$0xff]   ;;  %v345_v27 = vld [vmem:[%s485_s1 + $0xc0] ss:$8 sps:$4 sm:$0xff]  }
   0xa   :  { %v346_v28 = vld [vmem:[%s485_s1 + $0xd4] ss:$8 sps:$4 sm:$0xff]   ;;  %v348_v29 = vld [vmem:[%s485_s1 + $0xd0] ss:$8 sps:$4 sm:$0xff]   ;;  %v349_v30 = vld [vmem:[%s485_s1 + $0xe4] ss:$8 sps:$4 sm:$0xff]  }
   0xb   :  { %231 = vmatpush1.bf16.msra.mxu0 %v315_v5  ;;  %v351_v31 = vld [vmem:[%s485_s1 + $0xe0] ss:$8 sps:$4 sm:$0xff]   ;;  %v352_v32 = vld [vmem:[%s485_s1 + $0xf4] ss:$8 sps:$4 sm:$0xff]   ;;  %v354_v33 = vld [vmem:[%s485_s1 + $0xf0] ss:$8 sps:$4 sm:$0xff]  }
   0xc   :  { %232 = vmatprep.subr.bf16.mxu0 %v316_v6  ;;  %v51_v37 = vsub.s32 0, %v50_v36  ;;  %v47_v38 = vld [vmem:[%s487_s2] sm:$0x3]  ;;  %v55_v39 = vsub.s32 1, %v50_v36 }
   0xe   :  { %v52_v40 = vrot.slane %v47_v38, %v51_v37  ;;  %v56_v41 = vrot.slane %v47_v38, %v55_v39 }
   0xf   :  { %233 = vmatpush1.bf16.msra.mxu0 %v318_v7 }
  0x10   :  { %234 = vmatprep.subr.bf16.mxu0 %v319_v8 }
  0x13   :  { %235 = vmatpush1.bf16.msra.mxu0 %v321_v9 }
  0x14   :  { %236 = vmatprep.subr.bf16.mxu0 %v322_v10 }
  0x17   :  { %237 = vmatpush1.bf16.msra.mxu0 %v324_v11 }
  0x18   :  { %238 = vmatprep.subr.bf16.mxu0 %v325_v12 }
  0x1b   :  { %239 = vmatpush1.bf16.msra.mxu0 %v327_v15 }
  0x1c   :  { %240 = vmatprep.subr.bf16.mxu0 %v328_v16 }
  0x1f   :  { %241 = vmatpush1.bf16.msra.mxu0 %v330_v17 }
  0x20   :  { %242 = vmatprep.subr.bf16.mxu0 %v331_v18 }
  0x23   :  { %243 = vmatpush1.bf16.msra.mxu0 %v333_v19 }
  0x24   :  { %244 = vmatprep.subr.bf16.mxu0 %v334_v20 }
  0x27   :  { %245 = vmatpush1.bf16.msra.mxu0 %v336_v21 }
  0x28   :  { %246 = vmatprep.subr.bf16.mxu0 %v337_v22 }
  0x2b   :  { %247 = vmatpush1.bf16.msra.mxu0 %v339_v23 }
  0x2c   :  { %248 = vmatprep.subr.bf16.mxu0 %v340_v24 }
  0x2f   :  { %249 = vmatpush1.bf16.msra.mxu0 %v342_v25 }
  0x30   :  { %250 = vmatprep.subr.bf16.mxu0 %v343_v26 }
  0x33   :  { %251 = vmatpush1.bf16.msra.mxu0 %v345_v27 }
  0x34   :  { %252 = vmatprep.subr.bf16.mxu0 %v346_v28 }
  0x37   :  { %253 = vmatpush1.bf16.msra.mxu0 %v348_v29 }
  0x38   :  { %254 = vmatprep.subr.bf16.mxu0 %v349_v30 }
  0x3b   :  { %255 = vmatpush1.bf16.msra.mxu0 %v351_v31 }
  0x3c   :  { %256 = vmatprep.subr.bf16.mxu0 %v352_v32 }
  0x3f   :  { %257 = vmatpush1.bf16.msra.mxu0 %v354_v33 }
  0x42   :  { %259 = vmatmul.mubr.bf16.vlgmr.msra.gmra.mrb[0].mxu0 %v273_v34 }
 0x115   :  { %v260_v42 = vpop.f32.mrb[0].mxu0 }
 0x116   :  { %v261_v43 = vadd.f32 %v260_v42, %v52_v40  ;;  %v262_v44 = vpop.f32.mrb[1].mxu0 }
 0x117   :  { %v263_v45 = vadd.f32 %v262_v44, %v56_v41  ;;  %v264_v46 = vpop.f32.mrb[2].mxu0 }
 0x118   :  { %267 = vst [vmem:[%s488_s3] sm:$0xff] %v261_v43  ;;  %v265_v47 = vpop.f32.mrb[3].mxu0 }
 0x119   :  { %268 = vst [vmem:[%s488_s3 + $0x8] sm:$0xff] %v263_v45 }

</bundles_post_ra>
